<compile_context>
chip_gen: v6e
topology: v6e:2x2x1
jax: 0.10.0
libtpu: 0.0.40
codegen_flags: <defaults>
</compile_context>

<pallas_src>
import math
import functools

import jax
import jax.numpy as jnp
from jax.experimental import pallas as pl
from jax.experimental.pallas import tpu as pltpu


# --------------------------------------------------------------------------- #
# Kernel
# --------------------------------------------------------------------------- #
def _mha_kernel(x_ref, wqkv_ref, bqkv_ref, wp_ref, bp_ref, o_ref, *,
                num_heads, emb_size, seq_len, block_b, kv_block,
                compute_dtype):
    H, E, N, Bt = num_heads, emb_size, seq_len, block_b
    D = E // H
    G = Bt * H
    M = Bt * N
    cd = compute_dtype
    inv_scale = 1.0 / (E ** 0.5)   # module scales by sqrt(emb_size), not sqrt(head_dim)

    # ---- fused Q/K/V projection: one MXU matmul over M rows, 3E output cols ----
    x = x_ref[...].reshape(M, E)                                        # (M, E) bf16
    qkv = jnp.dot(x, wqkv_ref[...],
                  preferred_element_type=jnp.float32) + bqkv_ref[...]  # (M, 3E) f32

    q = qkv[:, :E] * inv_scale        # fold 1/sqrt(E) into q once
    k = qkv[:, E:2 * E]
    v = qkv[:, 2 * E:]

    # ---- split heads: '(b n) (h d) -> (b h) n d' ----
    def split(t):
        t = t.astype(cd).reshape(Bt, N, H, D)
        t = jnp.transpose(t, (0, 2, 1, 3))                              # (Bt, H, N, D)
        return t.reshape(G, N, D)

    qh, kh, vh = split(q), split(k), split(v)

    # ---- attention: KV-tiled online softmax (flash style) ----
    # Bounds the score footprint to (G, N, tk) f32 instead of (G, N, N).
    tk = min(kv_block, N)
    n_tiles = -(-N // tk)

    m_i = jnp.full((G, N, 1), -jnp.inf, jnp.float32)
    l_i = jnp.zeros((G, N, 1), jnp.float32)
    acc = jnp.zeros((G, N, D), jnp.float32)

    for j in range(n_tiles):          # static, fully unrolled (LLO-visible)
        lo = j * tk
        hi = min(N, lo + tk)
        k_j = kh[:, lo:hi, :]
        v_j = vh[:, lo:hi, :]
        # contracts last-dim vs last-dim (no materialized transpose of k)
        s = jnp.einsum('gqd,gkd->gqk', qh, k_j,
                       preferred_element_type=jnp.float32)              # (G, N, tile)
        m_new = jnp.maximum(m_i, s.max(axis=-1, keepdims=True))
        alpha = jnp.exp(m_i - m_new)
        # TODO(synk): optionally compute this exp in bf16 on v6e/v7x if EUP-bound.
        p = jnp.exp(s - m_new)
        l_i = alpha * l_i + p.sum(axis=-1, keepdims=True)
        acc = alpha * acc + jnp.einsum('gqk,gkd->gqd', p.astype(cd), v_j,
                                       preferred_element_type=jnp.float32)
        m_i = m_new

    # EUP reciprocal (~1e-3 rel err; use approx=False for training-grade output)
    ctx = acc * pl.reciprocal(l_i, approx=True)
    # (attention dropout == identity: eval semantics)

    # ---- merge heads '(b h) n d -> (b n) (h d)' into a lane-dense slab ----
    merged = jnp.transpose(ctx.reshape(Bt, H, N, D), (0, 2, 1, 3)).reshape(M, E)

    proj = jnp.dot(merged.astype(cd), wp_ref[...],
                   preferred_element_type=jnp.float32) + bp_ref[...]
    o_ref[...] = proj.reshape(Bt, N, E).astype(o_ref.dtype)


# --------------------------------------------------------------------------- #
# Wrapper helpers
# --------------------------------------------------------------------------- #
def _physical_vmem_bytes():
    try:
        return int(pltpu.get_tpu_info().vmem_capacity_bytes)
    except Exception:
        return 64 * 1024 * 1024        # conservative fallback (v7x per-TC VMEM)


def _vmem_estimate(block_b, N, E, H, tk, itm_c, out_itm):
    """Rough per-step VMEM footprint in bytes (weights single-buffered)."""
    M, G, D = block_b * N, block_b * H, E // H
    weights = (3 * E * E + E * E) * itm_c + 4 * E * 4           # W_qkv + W_p + biases
    io = 2 * block_b * N * E * (itm_c + out_itm)                # x/out double-buffered
    interm = (M * 3 * E * 4                                     # qkv (f32)
              + 3 * G * N * D * (4 + itm_c)                     # q/k/v split + bf16 cast
              + 2 * G * N * tk * 4                              # scores + exp
              + G * N * D * 4 + 2 * G * N * 4                   # acc, m, l
              + 2 * M * E * 4)                                  # merged + proj
    return weights + io + interm


def _auto_block_b(B, N, E, H, tk, itm_c, out_itm, usable_vmem):
    """Smallest divisor of B whose M = block_b*N fills >=256 MXU rows,
    shrunk until the (2x slack) VMEM estimate fits the budget."""
    divisors = [d for d in range(1, B + 1) if B % d == 0]
    pick = next((d for d in divisors if d * N >= 256), divisors[-1])
    i = divisors.index(pick)
    while i > 0 and 2 * _vmem_estimate(divisors[i], N, E, H, tk,
                                       itm_c, out_itm) > usable_vmem:
        i -= 1
    return divisors[i]


def _const_block_spec(shape):
    """Grid-invariant block: single-buffered (double-buffering buys nothing)."""
    idx = lambda b: (0,) * len(shape)
    try:
        return pl.BlockSpec(shape, idx, pipeline_mode=pl.Buffered(1))
    except (TypeError, AttributeError):   # older jax without pipeline_mode
        return pl.BlockSpec(shape, idx)


# --------------------------------------------------------------------------- #
# Public entry point
# --------------------------------------------------------------------------- #
def multi_head_attention(x, params, *, num_heads, block_b=None, kv_block=256,
                         compute_dtype=jnp.bfloat16):
    """x: (B, N, E).  params: transposed weights (E, E) and biases (1, E).

    kv_block: KV tile width of the in-kernel online-softmax loop.
    block_b:  batch elements per grid step (None -> auto: fill >=256 MXU rows,
              capped by the VMEM budget).  On v7x prefer a value that keeps
              B // block_b >= 2 so both TensorCores stay busy.
    """
    B, N, E = x.shape
    assert E % num_heads == 0
    out_dtype = x.dtype
    itm = jnp.dtype(compute_dtype).itemsize
    out_itm = jnp.dtype(out_dtype).itemsize
    tk = min(kv_block, N)

    phys_vmem = _physical_vmem_bytes()
    usable_vmem = int(phys_vmem * 0.85)    # headroom for compiler scratch / semaphores

    if block_b is None:
        block_b = _auto_block_b(B, N, E, num_heads, tk, itm, out_itm, usable_vmem)
    assert B % block_b == 0

    # Fused QKV weight (E, 3E): one MXU feed, lane-dense 3E-wide output slab.
    wqkv = jnp.concatenate([params["wq"], params["wk"], params["wv"]], axis=1)
    bqkv = jnp.concatenate([params["bq"], params["bk"], params["bv"]], axis=1)

    xc = x.astype(compute_dtype)
    wqkv = wqkv.astype(compute_dtype)
    wp = params["wp"].astype(compute_dtype)
    bqkv = bqkv.astype(jnp.float32)       # biases added after f32 accumulation
    bp = params["bp"].astype(jnp.float32)

    kernel = functools.partial(
        _mha_kernel, num_heads=num_heads, emb_size=E, seq_len=N,
        block_b=block_b, kv_block=kv_block, compute_dtype=compute_dtype)

    est = _vmem_estimate(block_b, N, E, num_heads, tk, itm, out_itm)
    vmem_limit = int(min(usable_vmem, max(32 * 1024 * 1024, 2 * est)))

    # Advisory cost estimate for XLA's scheduler.
    flops = 8 * B * N * E * E + 4 * B * N * N * E
    cost = pl.CostEstimate(
        flops=int(flops),
        transcendentals=int(B * num_heads * N * N),
        bytes_accessed=int(B * N * E * (itm + out_itm) + 4 * E * E * itm + 4 * E * 4))

    return pl.pallas_call(
        kernel,
        out_shape=jax.ShapeDtypeStruct((B, N, E), out_dtype),
        grid_spec=pltpu.PrefetchScalarGridSpec(
            num_scalar_prefetch=0,
            grid=(B // block_b,),
            in_specs=[
                pl.BlockSpec((block_b, N, E), lambda b: (b, 0, 0)),   # x
                _const_block_spec((E, 3 * E)),                        # W_qkv
                _const_block_spec((1, 3 * E)),                        # b_qkv
                _const_block_spec((E, E)),                            # W_proj
                _const_block_spec((1, E)),                            # b_proj
            ],
            out_specs=pl.BlockSpec((block_b, N, E), lambda b: (b, 0, 0)),
        ),
        compiler_params=pltpu.CompilerParams(
            dimension_semantics=("parallel",),
            vmem_limit_bytes=vmem_limit),
        cost_estimate=cost,
    )(xc, wqkv, bqkv, wp, bp)


# --------------------------------------------------------------------------- #
# Reference & test
# --------------------------------------------------------------------------- #
def _init_linear(key, emb_size):
    """Deterministic init mimicking nn.Linear (kaiming-uniform-ish bounds).
    Returns weight already transposed to (in, out) and bias as (1, out)."""
    kw, kb = jax.random.split(key)
    bound = 1.0 / math.sqrt(emb_size)
    w = jax.random.uniform(kw, (emb_size, emb_size), jnp.float32, -bound, bound)
    b = jax.random.uniform(kb, (1, emb_size), jnp.float32, -bound, bound)
    return w, b


def _reference(x, params, num_heads):
    """Pure-JAX f32 reference mirroring the PyTorch forward (dropout = identity)."""
    B, N, E = x.shape
    D = E // num_heads

    def lin(t, w, b):
        return t @ w + b

    def split_heads(t):  # 'b n (h d) -> b h n d'
        return t.reshape(B, N, num_heads, D).transpose(0, 2, 1, 3)

    q = split_heads(lin(x, params["wq"], params["bq"]))
    k = split_heads(lin(x, params["wk"], params["bk"]))
    v = split_heads(lin(x, params["wv"], params["bv"]))

    energy = jnp.einsum("bhqd,bhkd->bhqk", q, k)
    att = jax.nn.softmax(energy / (E ** 0.5), axis=-1)
    out = jnp.einsum("bhal,bhlv->bhav", att, v)
    out = out.transpose(0, 2, 1, 3).reshape(B, N, E)   # 'b h n d -> b n (h d)'
    return lin(out, params["wp"], params["bp"])


if __name__ == "__main__":
    B, N, E, H = 2, 8, 32, 4      # batch, seq, emb_size, num_heads

    key = jax.random.PRNGKey(0)
    kx, kq, kk, kv, kp = jax.random.split(key, 5)

    x = jax.random.normal(kx, (B, N, E), jnp.float32)

    wq, bq = _init_linear(kq, E)
    wk, bk = _init_linear(kk, E)
    wv, bv = _init_linear(kv, E)
    wp, bp = _init_linear(kp, E)
    params = dict(wq=wq, bq=bq, wk=wk, bk=bk, wv=wv, bv=bv, wp=wp, bp=bp)

    ref = _reference(x, params, H)

    # Default path: auto block_b (folds the whole batch here), single KV tile.
    out = jax.block_until_ready(multi_head_attention(x, params, num_heads=H))
    assert out.shape == (B, N, E)
    # bf16 MXU inputs (f32 accumulation) + approx reciprocal vs f32 reference
    # -> relaxed tolerance (standard for bf16 attention kernels).
    assert jnp.allclose(out, ref, atol=2e-2, rtol=2e-2), (
        f"default path mismatch: max abs err {jnp.max(jnp.abs(out - ref))}")

    # Multi-tile path: exercises the online-softmax (flash) update and block_b=1 / grid=(2,).
    out_f = jax.block_until_ready(
        multi_head_attention(x, params, num_heads=H, kv_block=4, block_b=1))
    assert jnp.allclose(out_f, ref, atol=2e-2, rtol=2e-2), (
        f"flash path mismatch: max abs err {jnp.max(jnp.abs(out_f - ref))}")

    print("KERNEL_OK")
</pallas_src>

<mosaic_0001>
module attributes {stable_mosaic.version = 11 : i64} {
  func.func @_mha_kernel(%arg0: i32, %arg1: memref<2x8x32xbf16, #tpu.memory_space<vmem>>, %arg2: memref<32x96xbf16, #tpu.memory_space<vmem>>, %arg3: memref<1x96xf32, #tpu.memory_space<vmem>>, %arg4: memref<32x32xbf16, #tpu.memory_space<vmem>>, %arg5: memref<1x32xf32, #tpu.memory_space<vmem>>, %arg6: memref<2x8x32xf32, #tpu.memory_space<vmem>>) attributes {dimension_semantics = [#tpu.dimension_semantics<parallel>], iteration_bounds = array<i64: 1>, scalar_prefetch = 0 : i64, scratch_operands = 0 : i64, tpu.core_type = #tpu.core_type<tc>, window_params = [{transform_indices = @transform_0, window_bounds = array<i64: 2, 8, 32>}, {pipeline_mode = #tpu.pipeline_mode<synchronous>, transform_indices = @transform_1, window_bounds = array<i64: 32, 96>}, {pipeline_mode = #tpu.pipeline_mode<synchronous>, transform_indices = @transform_2, window_bounds = array<i64: 1, 96>}, {pipeline_mode = #tpu.pipeline_mode<synchronous>, transform_indices = @transform_3, window_bounds = array<i64: 32, 32>}, {pipeline_mode = #tpu.pipeline_mode<synchronous>, transform_indices = @transform_4, window_bounds = array<i64: 1, 32>}, {transform_indices = @transform_5, window_bounds = array<i64: 2, 8, 32>}]} {
    %c0 = arith.constant 0 : index
    %c0_0 = arith.constant 0 : index
    %c0_1 = arith.constant 0 : index
    %0 = vector.load %arg1[%c0, %c0_0, %c0_1] : memref<2x8x32xbf16, #tpu.memory_space<vmem>>, vector<2x8x32xbf16>
    %1 = vector.shape_cast %0 : vector<2x8x32xbf16> to vector<16x32xbf16>
    %c0_2 = arith.constant 0 : index
    %c0_3 = arith.constant 0 : index
    %2 = vector.load %arg2[%c0_2, %c0_3] : memref<32x96xbf16, #tpu.memory_space<vmem>>, vector<32x96xbf16>
    %cst = arith.constant dense<0.000000e+00> : vector<16x96xf32>
    %3 = tpu.matmul %1, %2, %cst {dimension_numbers = #tpu.dot_dimension_numbers<[1], [0], [0], [1], [0, 0, 1, 1], [], []>} : vector<16x32xbf16>, vector<32x96xbf16>, vector<16x96xf32> -> vector<16x96xf32>
    %c0_4 = arith.constant 0 : index
    %c0_5 = arith.constant 0 : index
    %4 = vector.load %arg3[%c0_4, %c0_5] : memref<1x96xf32, #tpu.memory_space<vmem>>, vector<1x96xf32>
    %5 = vector.broadcast %4 : vector<1x96xf32> to vector<16x96xf32>
    %6 = arith.addf %3, %5 : vector<16x96xf32>
    %7 = vector.extract_strided_slice %6 {offsets = [0, 0], sizes = [16, 32], strides = [1, 1]} : vector<16x96xf32> to vector<16x32xf32>
    %cst_6 = arith.constant 0.176776692 : f32
    %8 = vector.broadcast %cst_6 : f32 to vector<16x32xf32>
    %9 = arith.mulf %7, %8 : vector<16x32xf32>
    %10 = vector.extract_strided_slice %6 {offsets = [0, 32], sizes = [16, 32], strides = [1, 1]} : vector<16x96xf32> to vector<16x32xf32>
    %11 = vector.extract_strided_slice %6 {offsets = [0, 64], sizes = [16, 32], strides = [1, 1]} : vector<16x96xf32> to vector<16x32xf32>
    %12 = arith.truncf %9 : vector<16x32xf32> to vector<16x32xbf16>
    %13 = vector.shape_cast %12 : vector<16x32xbf16> to vector<2x8x4x8xbf16>
    %14 = tpu.transpose %13, [0, 2, 1, 3] : vector<2x8x4x8xbf16> -> vector<2x4x8x8xbf16>
    %15 = vector.shape_cast %14 : vector<2x4x8x8xbf16> to vector<8x8x8xbf16>
    %16 = arith.truncf %10 : vector<16x32xf32> to vector<16x32xbf16>
    %17 = vector.shape_cast %16 : vector<16x32xbf16> to vector<2x8x4x8xbf16>
    %18 = tpu.transpose %17, [0, 2, 1, 3] : vector<2x8x4x8xbf16> -> vector<2x4x8x8xbf16>
    %19 = vector.shape_cast %18 : vector<2x4x8x8xbf16> to vector<8x8x8xbf16>
    %20 = arith.truncf %11 : vector<16x32xf32> to vector<16x32xbf16>
    %21 = vector.shape_cast %20 : vector<16x32xbf16> to vector<2x8x4x8xbf16>
    %22 = tpu.transpose %21, [0, 2, 1, 3] : vector<2x8x4x8xbf16> -> vector<2x4x8x8xbf16>
    %23 = vector.shape_cast %22 : vector<2x4x8x8xbf16> to vector<8x8x8xbf16>
    %cst_7 = arith.constant 0xFF800000 : f32
    %24 = vector.broadcast %cst_7 : f32 to vector<8x8x1xf32>
    %cst_8 = arith.constant 0.000000e+00 : f32
    %25 = vector.broadcast %cst_8 : f32 to vector<8x8x1xf32>
    %cst_9 = arith.constant 0.000000e+00 : f32
    %26 = vector.broadcast %cst_9 : f32 to vector<8x8x8xf32>
    "tpu.trace_start"() <{level = 10 : i32, message = "gqd,gkd->gqk"}> : () -> ()
    %cst_10 = arith.constant dense<0.000000e+00> : vector<8x8x8xf32>
    %27 = tpu.matmul %15, %19, %cst_10 {dimension_numbers = #tpu.dot_dimension_numbers<[2], [2], [1], [1], [0, 0, 0, 1, 1, 1], [0], [0]>} : vector<8x8x8xbf16>, vector<8x8x8xbf16>, vector<8x8x8xf32> -> vector<8x8x8xf32>
    "tpu.trace_stop"() : () -> ()
    %cst_11 = arith.constant dense<0xFF800000> : vector<8x8xf32>
    %28 = vector.multi_reduction <maximumf>, %27, %cst_11 [2] : vector<8x8x8xf32> to vector<8x8xf32>
    %29 = vector.shape_cast %28 : vector<8x8xf32> to vector<8x8x1xf32>
    %30 = arith.maximumf %24, %29 : vector<8x8x1xf32>
    %31 = arith.subf %24, %30 : vector<8x8x1xf32>
    %32 = math.exp %31 : vector<8x8x1xf32>
    %33 = vector.broadcast %30 : vector<8x8x1xf32> to vector<8x8x8xf32>
    %34 = arith.subf %27, %33 : vector<8x8x8xf32>
    %35 = math.exp %34 : vector<8x8x8xf32>
    %36 = arith.mulf %32, %25 : vector<8x8x1xf32>
    %cst_12 = arith.constant dense<0.000000e+00> : vector<8x8xf32>
    %37 = vector.multi_reduction <add>, %35, %cst_12 [2] : vector<8x8x8xf32> to vector<8x8xf32>
    %38 = vector.shape_cast %37 : vector<8x8xf32> to vector<8x8x1xf32>
    %39 = arith.addf %36, %38 : vector<8x8x1xf32>
    %40 = vector.broadcast %32 : vector<8x8x1xf32> to vector<8x8x8xf32>
    %41 = arith.mulf %40, %26 : vector<8x8x8xf32>
    %42 = arith.truncf %35 : vector<8x8x8xf32> to vector<8x8x8xbf16>
    "tpu.trace_start"() <{level = 10 : i32, message = "gqk,gkd->gqd"}> : () -> ()
    %cst_13 = arith.constant dense<0.000000e+00> : vector<8x8x8xf32>
    %43 = tpu.matmul %42, %23, %cst_13 {dimension_numbers = #tpu.dot_dimension_numbers<[2], [1], [1], [2], [0, 0, 0, 1, 1, 2], [0], [0]>} : vector<8x8x8xbf16>, vector<8x8x8xbf16>, vector<8x8x8xf32> -> vector<8x8x8xf32>
    "tpu.trace_stop"() : () -> ()
    %44 = arith.addf %41, %43 : vector<8x8x8xf32>
    %45 = tpu.reciprocal %39 {approx = true} : vector<8x8x1xf32> -> vector<8x8x1xf32>
    %46 = vector.broadcast %45 : vector<8x8x1xf32> to vector<8x8x8xf32>
    %47 = arith.mulf %44, %46 : vector<8x8x8xf32>
    %48 = vector.shape_cast %47 : vector<8x8x8xf32> to vector<2x4x8x8xf32>
    %49 = tpu.transpose %48, [0, 2, 1, 3] : vector<2x4x8x8xf32> -> vector<2x8x4x8xf32>
    %50 = vector.shape_cast %49 : vector<2x8x4x8xf32> to vector<16x32xf32>
    %51 = arith.truncf %50 : vector<16x32xf32> to vector<16x32xbf16>
    %c0_14 = arith.constant 0 : index
    %c0_15 = arith.constant 0 : index
    %52 = vector.load %arg4[%c0_14, %c0_15] : memref<32x32xbf16, #tpu.memory_space<vmem>>, vector<32x32xbf16>
    %cst_16 = arith.constant dense<0.000000e+00> : vector<16x32xf32>
    %53 = tpu.matmul %51, %52, %cst_16 {dimension_numbers = #tpu.dot_dimension_numbers<[1], [0], [0], [1], [0, 0, 1, 1], [], []>} : vector<16x32xbf16>, vector<32x32xbf16>, vector<16x32xf32> -> vector<16x32xf32>
    %c0_17 = arith.constant 0 : index
    %c0_18 = arith.constant 0 : index
    %54 = vector.load %arg5[%c0_17, %c0_18] : memref<1x32xf32, #tpu.memory_space<vmem>>, vector<1x32xf32>
    %55 = vector.broadcast %54 : vector<1x32xf32> to vector<16x32xf32>
    %56 = arith.addf %53, %55 : vector<16x32xf32>
    %57 = vector.shape_cast %56 : vector<16x32xf32> to vector<2x8x32xf32>
    %c0_19 = arith.constant 0 : index
    %c0_20 = arith.constant 0 : index
    %c0_21 = arith.constant 0 : index
    %58 = vector.load %arg6[%c0_19, %c0_20, %c0_21] : memref<2x8x32xf32, #tpu.memory_space<vmem>>, vector<2x8x32xf32>
    tpu.vector_store %arg6[%c0_19, %c0_20, %c0_21], %57 {strides = array<i32>} : memref<2x8x32xf32, #tpu.memory_space<vmem>>, vector<2x8x32xf32>,
    return
  }
  func.func @transform_0(%arg0: i32) -> (i32, i32, i32) {
    %c0_i32 = arith.constant 0 : i32
    %c0_i32_0 = arith.constant 0 : i32
    %c0_i32_1 = arith.constant 0 : i32
    return %arg0, %c0_i32, %c0_i32_0 : i32, i32, i32
  }
  func.func @transform_1(%arg0: i32) -> (i32, i32) {
    %c0_i32 = arith.constant 0 : i32
    %c0_i32_0 = arith.constant 0 : i32
    %c0_i32_1 = arith.constant 0 : i32
    return %c0_i32, %c0_i32_0 : i32, i32
  }
  func.func @transform_2(%arg0: i32) -> (i32, i32) {
    %c0_i32 = arith.constant 0 : i32
    %c0_i32_0 = arith.constant 0 : i32
    %c0_i32_1 = arith.constant 0 : i32
    return %c0_i32, %c0_i32_0 : i32, i32
  }
  func.func @transform_3(%arg0: i32) -> (i32, i32) {
    %c0_i32 = arith.constant 0 : i32
    %c0_i32_0 = arith.constant 0 : i32
    %c0_i32_1 = arith.constant 0 : i32
    return %c0_i32, %c0_i32_0 : i32, i32
  }
  func.func @transform_4(%arg0: i32) -> (i32, i32) {
    %c0_i32 = arith.constant 0 : i32
    %c0_i32_0 = arith.constant 0 : i32
    %c0_i32_1 = arith.constant 0 : i32
    return %c0_i32, %c0_i32_0 : i32, i32
  }
  func.func @transform_5(%arg0: i32) -> (i32, i32, i32) {
    %c0_i32 = arith.constant 0 : i32
    %c0_i32_0 = arith.constant 0 : i32
    %c0_i32_1 = arith.constant 0 : i32
    return %arg0, %c0_i32, %c0_i32_0 : i32, i32, i32
  }
}

</mosaic_0001>

<bundles_post_ra>
// kernel: tpu_custom_call.1
= control target key start
LH: loop header
LB: loop body
LE: loop exit
PB: predicated region body
PF: predicated region fallthrough
CT: control target
= control target key end

     0   :  { %10 = vsyncpa [#allocation3], 0  ;;  %s3075_s0 = inlined_call_operand.hbm [shape: bf16[2,8,32], index: 0, kind: input, shape index: {}]   ;;  %s3076_s1 = inlined_call_operand.hbm [shape: bf16[32,96], index: 1, kind: input, shape index: {}]   ;;  %s3077_s2 = inlined_call_operand.vmem [shape: f32[1,96], index: 2, kind: input, shape index: {}]   ;;  %s3078_s3 = inlined_call_operand.hbm [shape: bf16[32,32], index: 3, kind: input, shape index: {}]   ;;  %s3079_s4 = inlined_call_operand.vmem [shape: f32[1,32], index: 4, kind: input, shape index: {}]   ;;  %s3080_s5 = inlined_call_operand.hbm [shape: f32[2,8,32], index: 5, kind: output, shape index: {}]  }
   0x1   :  { %11 = vsyncpa [#allocation6], 0 }
   0x2   :  { %12 = vsyncpa [#allocation4], 0  ;;  %s2632_s18 = smov [#allocation5]   ;;  %s2633_s20 = smov [#allocation2]  }
   0x3   :  { %s30_s19 = sshll.u32 %s2632_s18, 4  ;;  %s18_s21 = sshll.u32 %s2633_s20, 4  ;;  %s31_s19 = int_to_ptr.vmem [resolvable:$true] %s30_s19  ;;  %s19_s21 = int_to_ptr.vmem [resolvable:$true] %s18_s21 }
   0x4   :  { %s2554_s22 = scalar_lea.vmem %s31_s19, 256  ;;  %p2559_p1 = scmp.lt.s32.totalorder %s31_s19, %s31_s19 }
   0x5   :  { %p2555_p0 = scmp.ne.s32.totalorder %s31_s19, %s2554_s22  ;;  %p2560_p2 = scmp.lt.s32.totalorder %s2554_s22, %s2554_s22 }
   0x7   :  { %p2561_p3 = por %p2560_p2, %p2559_p1 }
   0x9   :  { %p2562_p4 = pnand %p2561_p3, %p2555_p0 }
   0xb   :  { %2565 = shalt.err (!%p2562_p4)
}
   0xc   :  { %s2634_s23 = smov 64   ;;  %s2635_s24 = smov 4  }
   0xd   :  { %36 = dma.hbm_to_vmem [thread:$0]  %s3076_s1, 256, %s31_s19, [#allocation6], %s2634_s23, %s2634_s23, %s2635_s24  }
   0xe   :  { %s2574_s27 = scalar_lea.vmem %s19_s21, 128  ;;  %p2579_p6 = scmp.lt.s32.totalorder %s19_s21, %s19_s21 }
   0xf   :  { %p2575_p5 = scmp.ne.s32.totalorder %s19_s21, %s2574_s27  ;;  %p2580_p7 = scmp.lt.s32.totalorder %s2574_s27, %s2574_s27 }
  0x11   :  { %p2581_p8 = por %p2580_p7, %p2579_p6 }
  0x13   :  { %p2582_p9 = pnand %p2581_p8, %p2575_p5 }
  0x15   :  { %2585 = shalt.err (!%p2582_p9)
}
  0x16   :  { %24 = dma.hbm_to_vmem [thread:$0]  %s3075_s0, 128, %s19_s21, [#allocation3], %s2634_s23, %s2634_s23, %s2635_s24  }
  0x17   :  { %s2636_s30 = smov [#allocation7]  }
  0x18   :  { %s44_s6 = sshll.u32 %s2636_s30, 4  ;;  %s45_s6 = int_to_ptr.vmem [resolvable:$true] %s44_s6 }
  0x19   :  { %s2594_s7 = scalar_lea.vmem %s45_s6, 256  ;;  %p2599_p11 = scmp.lt.s32.totalorder %s45_s6, %s45_s6 }
  0x1a   :  { %p2595_p10 = scmp.ne.s32.totalorder %s45_s6, %s2594_s7  ;;  %p2600_p12 = scmp.lt.s32.totalorder %s2594_s7, %s2594_s7 }
  0x1c   :  { %p2601_p13 = por %p2600_p12, %p2599_p11 }
  0x1e   :  { %p2602_p0 = pnand %p2601_p13, %p2595_p10 }
  0x20   :  { %2605 = shalt.err (!%p2602_p0)
}
  0x21   :  { %50 = dma.hbm_to_vmem [thread:$0]  %s3078_s3, 256, %s45_s6, [#allocation6], %s2634_s23, %s2634_s23, %s2635_s24  }
  0x22   :  { %2626 = dma.done.wait [#allocation3], 128  }
  0x23   :  { %2627 = vsyncadd [#allocation3], 4294967168 }
  0x24   :  { %2628 = dma.done.wait [#allocation6], 512  }
  0x25   :  { %2629 = vsyncadd [#allocation6], 4294966784  ;;  %v2637_v0 = vmov 0.0   ;;  %vm2638_vm0 = vmmov 0   ;;  %v2493_v1 = vld [vmem:[#allocation5 + $0x8] sm:$0xff]   ;;  %v2494_v2 = vld [vmem:[#allocation5] sm:$0xff]   ;;  %v174_v21 = vlaneseq }
  0x26   :  { %2347 = vmatprep.subr.bf16.mxu0 %v2637_v0  ;;  %2351 = vmatprep.mubr.msk.bf16.mxu0 %vm2638_vm0, %v2637_v0  ;;  %v2495_v3 = vld [vmem:[#allocation2] sm:$0xff]   ;;  %vm93_vm1 = vcmask 261120   ;;  %s2639_s9 = smov 104   ;;  %s2640_s10 = smov 120   ;;  %v2643_v19 = vmov 1983009808  }
  0x27   :  { %2355 = vmatprep.subr.bf16.mxu1 %v2637_v0  ;;  %2357 = vmatprep.mubr.msk.bf16.mxu1 %vm2638_vm0, %v2637_v0  ;;  %v2268_v4 = vld [vmem:[%s3077_s2] ss:$0 sm:$0xff]  ;;  %s2641_s11 = smov 96   ;;  %s2642_s12 = smov 112   ;;  %v172_v20 = vunpack.c.l.s4 %v2643_v19  ;;  %v175_v24 = vshrl.u32 %v174_v21, 7  ;;  %v2645_v45 = vmov 0  }
  0x28   :  { %2348 = vmatpush3.bf16.msra.mxu0 %v2493_v1  ;;  %v2644_v27 = vmov 1934713408   ;;  %v2731_v46 = vpack.i.b16 %v2645_v45, %v2645_v45  ;;  %vm994_vm2 = vcmask 64512   ;;  %vm1486_vm3 = vcmask 1043456   ;;  %s2646_s2 = smov 16   ;;  %s2647_s13 = smov 8  }
  0x29   :  { %2349 = vmatprep.subr.bf16.mxu0 %v2637_v0  ;;  %v173_v23 = vunpack.c.0.s8 %v172_v20  ;;  %v203_v28 = vunpack.c.l.s4 %v2644_v27  ;;  %s2648_s14 = smov 24   ;;  %vm2174_vm4 = vcmask 130048   ;;  %vm2177_vm5 = vcmask 195584   ;;  %s2649_s17 = smov [#allocation8]  }
  0x2a   :  { %s2255_s18 = sshll.u32 %s2649_s17, 4  ;;  %s2256_s18 = int_to_ptr.vmem [resolvable:$true] %s2255_s18 }
  0x2b   :  { %v2723_v32 = vsub.s32 %v173_v23, %v175_v24  ;;  %v204_v35 = vunpack.c.0.s8 %v203_v28  ;;  %s2606_s19 = scalar_lea.vmem %s2256_s18, 256  ;;  %p2611_p2 = scmp.lt.s32.totalorder %s2256_s18, %s2256_s18 }
  0x2c   :  { %2350 = vmatpush3.bf16.msra.mxu0 %v2494_v2  ;;  %p2607_p1 = scmp.ne.s32.totalorder %s2256_s18, %s2606_s19  ;;  %p2612_p3 = scmp.lt.s32.totalorder %s2606_s19, %s2606_s19 }
  0x2d   :  { %2361 = vmatprep.subr.bf16.mxu0 %v2637_v0  ;;  %v2727_v42 = vsub.s32 %v204_v35, %v175_v24 }
  0x2e   :  { %p2613_p4 = por %p2612_p3, %p2611_p2 }
  0x2f   :  { %2352 = vmatmul.mubr.msk.bf16.vlgmr.msra.gmra.mxu0 %vm93_vm1, %v2495_v3 }
  0x30   :  { %2363 = vmatprep.mubr.msk.bf16.mxu0 %vm2638_vm0, %v2637_v0  ;;  %p2614_p5 = pnand %p2613_p4, %p2607_p1 }
  0xef   :  { %v131_v5 = vpop.f32.mrf.mxu0 }
  0xf0   :  { %v132_v7 = vadd.f32 %v2268_v4, %v131_v5 }
  0xf1   :  { %v2353_v6 = vpop.f32.mrf.mxu0 }
  0xf2   :  { %v138_v11 = vmul.f32 0.17677669, %v132_v7 }
  0xf3   :  { %v134_v8 = vpop.f32.mrf.mxu0 }
  0xf4   :  { %v135_v9 = vadd.f32 %v2268_v4, %v134_v8 }
  0xf5   :  { %v2354_v10 = vpop.f32.mrf.mxu0 }
  0xf6   :  { %v139_v12 = vmul.f32 0.17677669, %v135_v9  ;;  %v426_v13 = vpack.c.bf16 %v135_v9, %v132_v7 }
  0xf8   :  { %v2710_v14 = vpack.c.bf16 %v139_v12, %v138_v11  ;;  %432 = vrot.lane.b32.xlu1 %v426_v13, %s2639_s9  ;;  %428 = vrot.lane.b32.xlu0 %v426_v13, %s2640_s10 }
  0xfa   :  { %v152_v49 = vshrl.u32 %v2710_v14, 16 }
  0xfc   :  { %434 = vrot.lane.b32.xlu1 %v426_v13, %s2641_s11  ;;  %430 = vrot.lane.b32.xlu0 %v426_v13, %s2642_s12 }
 0x16a   :  { %v429_v15 = vpop.permute.xlu0 %428  ;;  %v2712_v16 = vpop.permute.xlu1 %432 }
 0x16b   :  { %436 = vrot.lane.b32.xlu0 %v429_v15, %s2641_s11 }
 0x16e   :  { %v2714_v17 = vpop.permute.xlu0 %430  ;;  %v435_v18 = vpop.permute.xlu1 %434 }
 0x16f   :  { %440 = vrot.lane.b32.xlu0 %v2712_v16, %s2641_s11  ;;  %438 = vrot.lane.b32.xlu1 %v2714_v17, %s2641_s11  ;;  %v446_v38 = vshrl.u32 %v435_v18, 16 }
 0x173   :  { %144 = vrot.lane.b32.xlu0 %v2710_v14, %s2642_s12  ;;  %142 = vrot.lane.b32.xlu1 %v2710_v14, %s2640_s10 }
 0x177   :  { %714 = vrot.lane.b32.xlu0 %v426_v13, %s2634_s23  ;;  %146 = vrot.lane.b32.xlu1 %v2710_v14, %s2639_s9 }
 0x17b   :  { %716 = vrot.lane.b32.xlu1 %v429_v15, %s2634_s23 }
 0x1dd   :  { %v437_v22 = vpop.permute.xlu0 %436 }
 0x1de   :  { %v444_v33 = vpack.i.b16 %v437_v22, %v435_v18  ;;  %v447_v34 = vshrl.u32 %v437_v22, 16 }
 0x1e0   :  { %v465_v40 = vrot.slane %v444_v33, %v2723_v32  ;;  %v448_v41 = vpack.i.b16 %v447_v34, %v446_v38  ;;  %v458_v1 = vcombine.high %v444_v33, %v2731_v46 }
 0x1e1   :  { %v439_v25 = vpop.permute.xlu1 %438  ;;  %v441_v26 = vpop.permute.xlu0 %440 }
 0x1e2   :  { %v452_v29 = vpack.i.b16 %v441_v26, %v439_v25  ;;  %v454_v30 = vshrl.u32 %v439_v25, 16  ;;  %v455_v31 = vshrl.u32 %v441_v26, 16  ;;  %v524_v52 = vcombine.high %v448_v41, %v2731_v46 }
 0x1e3   :  { %v531_v53 = vrot.slane %v448_v41, %v2723_v32  ;;  %v472_v15 = vrot.slane %v458_v1, %v2723_v32 }
 0x1e4   :  { %v480_v36 = vrot.slane %v452_v29, %v2723_v32  ;;  %v456_v39 = vpack.i.b16 %v455_v31, %v454_v30  ;;  %v473_v56 = vcombine.high %v452_v29, %v2731_v46  ;;  %v538_v7 = vrot.slane %v524_v52, %v2723_v32 }
 0x1e5   :  { %v143_v37 = vpop.permute.xlu1 %142  ;;  %v145_v48 = vpop.permute.xlu0 %144 }
 0x1e6   :  { %v488_v43 = vcombine.low %v465_v40, %v480_v36  ;;  %v489_v44 = vcombine.high %v465_v40, %v480_v36  ;;  %v546_v47 = vrot.slane %v456_v39, %v2723_v32  ;;  %v153_v50 = vshrl.u32 %v143_v37, 16 }
 0x1e7   :  { %v539_v54 = vcombine.high %v456_v39, %v2731_v46  ;;  %v2739_v55 = vpack.i.b16 %v143_v37, %v2710_v14  ;;  %v160_v59 = vshrl.u32 %v145_v48, 16  ;;  %v487_v8 = vrot.slane %v473_v56, %v2723_v32 }
 0x1e8   :  { %v496_v57 = vrot.slane %v488_v43, %v2727_v42  ;;  %v503_v58 = vrot.slane %v489_v44, %v2727_v42  ;;  %v554_v60 = vcombine.low %v531_v53, %v546_v47  ;;  %v555_v61 = vcombine.high %v531_v53, %v546_v47 }
 0x1e9   :  { %v147_v51 = vpop.permute.xlu1 %146  ;;  %v154_v2 = vpack.i.b16 %v153_v50, %v152_v49  ;;  %v553_v3 = vrot.slane %v539_v54, %v2723_v32  ;;  %v177_v4 = vrot.slane %v2739_v55, %v2723_v32  ;;  %v170_v18 = vcombine.high %v2739_v55, %v2731_v46 }
 0x1ea   :  { %v158_v62 = vpack.i.b16 %v147_v51, %v145_v48  ;;  %v161_v63 = vshrl.u32 %v147_v51, 16  ;;  %v590_v9 = vcombine.low %v496_v57, %v503_v58  ;;  %v2277_v10 = vcombine.high %v496_v57, %v503_v58 }
 0x1eb   :  { %v562_v11 = vrot.slane %v554_v60, %v2727_v42  ;;  %v569_v12 = vrot.slane %v555_v61, %v2727_v42  ;;  %v243_v19 = vrot.slane %v154_v2, %v2723_v32  ;;  %v570_v21 = vcombine.low %v538_v7, %v553_v3 }
 0x1ec   :  { %v162_v5 = vpack.i.b16 %v161_v63, %v160_v59  ;;  %v192_v6 = vrot.slane %v158_v62, %v2723_v32  ;;  %v571_v22 = vcombine.high %v538_v7, %v553_v3  ;;  %v597_v27 = vrot.slane %v590_v9, %v2723_v32 }
 0x1ed   :  { %v605_v28 = vrot.slane %v2277_v10, %v2723_v32  ;;  %v504_v29 = vcombine.low %v472_v15, %v487_v8  ;;  %v505_v30 = vcombine.high %v472_v15, %v487_v8  ;;  %v615_v31 = vcombine.low %v562_v11, %v569_v12 }
 0x1ee   :  { %v200_v13 = vcombine.low %v177_v4, %v192_v6  ;;  %v201_v14 = vcombine.high %v177_v4, %v192_v6  ;;  %v258_v20 = vrot.slane %v162_v5, %v2723_v32  ;;  %v251_v33 = vcombine.high %v162_v5, %v2731_v46 }
 0x1ef   :  { %v578_v38 = vrot.slane %v570_v21, %v2727_v42  ;;  %v2278_v39 = vcombine.high %v562_v11, %v569_v12  ;;  %v236_v40 = vcombine.high %v154_v2, %v2731_v46  ;;  %v185_v41 = vcombine.high %v158_v62, %v2731_v46 }
 0x1f0   :  { %v208_v23 = vrot.slane %v200_v13, %v2727_v42  ;;  %v215_v24 = vrot.slane %v201_v14, %v2727_v42  ;;  %v266_v25 = vcombine.low %v243_v19, %v258_v20  ;;  %v267_v26 = vcombine.high %v243_v19, %v258_v20 }
 0x1f1   :  { %v585_v43 = vrot.slane %v571_v22, %v2727_v42  ;;  %v606_v48 = vcombine.low %v597_v27, %v605_v28  ;;  %v512_v49 = vrot.slane %v504_v29, %v2727_v42  ;;  %v519_v50 = vrot.slane %v505_v30, %v2727_v42 }
 0x1f2   :  { %v274_v34 = vrot.slane %v266_v25, %v2727_v42  ;;  %v281_v35 = vrot.slane %v267_v26, %v2727_v42  ;;  %v302_v36 = vcombine.low %v208_v23, %v215_v24  ;;  %v2273_v37 = vcombine.high %v208_v23, %v215_v24 }
 0x1f3   :  { %v265_v51 = vrot.slane %v251_v33, %v2723_v32  ;;  %v622_v52 = vrot.slane %v615_v31, %v2723_v32  ;;  %v199_v57 = vrot.slane %v185_v41, %v2723_v32  ;;  %v630_v58 = vrot.slane %v2278_v39, %v2723_v32 }
 0x1f4   :  { %v327_v44 = vcombine.low %v274_v34, %v281_v35  ;;  %v2274_v47 = vcombine.high %v274_v34, %v281_v35  ;;  %v309_v53 = vrot.slane %v302_v36, %v2723_v32  ;;  %v317_v54 = vrot.slane %v2273_v37, %v2723_v32 }
 0x1f5   :  { %v665_v59 = vcombine.low %v578_v38, %v585_v43  ;;  %v250_v60 = vrot.slane %v236_v40, %v2723_v32  ;;  %v613_v61 = vrot.slane %v606_v48, %v2727_v42  ;;  %v2280_v63 = vcombine.high %v578_v38, %v585_v43 }
 0x1f6   :  { %v334_v55 = vrot.slane %v327_v44, %v2723_v32  ;;  %v342_v56 = vrot.slane %v2274_v47, %v2723_v32  ;;  %v184_v1 = vrot.slane %v170_v18, %v2723_v32  ;;  %v631_v2 = vcombine.low %v622_v52, %v630_v58 }
 0x1f7   :  { %v640_v3 = vcombine.low %v512_v49, %v519_v50  ;;  %v282_v4 = vcombine.low %v250_v60, %v265_v51  ;;  %v283_v5 = vcombine.high %v250_v60, %v265_v51  ;;  %v318_v6 = vcombine.low %v309_v53, %v317_v54 }
 0x1f8   :  { %v343_v62 = vcombine.low %v334_v55, %v342_v56  ;;  %v2279_v7 = vcombine.high %v512_v49, %v519_v50  ;;  %v216_v8 = vcombine.low %v184_v1, %v199_v57  ;;  %v638_v9 = vrot.slane %v631_v2, %v2727_v42 }
 0x1f9   :  { %v217_v10 = vcombine.high %v184_v1, %v199_v57  ;;  %v693_v11 = vshrl.u32 %v613_v61, 16  ;;  %v672_v13 = vrot.slane %v665_v59, %v2723_v32  ;;  %v680_v19 = vrot.slane %v2280_v63, %v2723_v32 }
 0x1fa   :  { %v350_v12 = vrot.slane %v343_v62, %v2727_v42  ;;  %v692_v14 = vpack.i.b16 %v638_v9, %v613_v61  ;;  %v694_v15 = vshrl.u32 %v638_v9, 16  ;;  %v639_v18 = vcombine.high %v638_v9, %v2645_v45 }
 0x1fb   :  { %v647_v20 = vrot.slane %v640_v3, %v2723_v32  ;;  %v290_v21 = vrot.slane %v282_v4, %v2727_v42  ;;  %v297_v22 = vrot.slane %v283_v5, %v2727_v42  ;;  %v325_v23 = vrot.slane %v318_v6, %v2727_v42 }
 0x1fc   :  { %v655_v24 = vrot.slane %v2279_v7, %v2723_v32  ;;  %v999_v25 = vsel %vm994_vm2, %v692_v14, 0  ;;  %v695_v26 = vpack.i.b16 %v694_v15, %v693_v11  ;;  %v614_v27 = vcombine.high %v613_v61, %v2645_v45 }
 0x1fd   :  { %v224_v28 = vrot.slane %v216_v8, %v2727_v42  ;;  %v231_v29 = vrot.slane %v217_v10, %v2727_v42  ;;  %2356 = vmatpush3.bf16.xpose.msra.mxu1 %v999_v25  ;;  %v406_v31 = vshrl.u32 %v350_v12, 16  ;;  %v700_v33 = vshrl.u32 %v639_v18, 16 }
 0x1fe   :  { %v1045_v30 = vsel %vm994_vm2, %v695_v26, 0  ;;  %2367 = vmatprep.subr.bf16.mxu1 %v2637_v0  ;;  %v681_v34 = vcombine.low %v672_v13, %v680_v19  ;;  %v377_v35 = vcombine.low %v290_v21, %v297_v22  ;;  %v2276_v36 = vcombine.high %v290_v21, %v297_v22 }
 0x1ff   :  { %2362 = vmatpush3.bf16.xpose.msra.mxu0 %v1045_v30  ;;  %v405_v37 = vshrl.u32 %v325_v23, 16  ;;  %v404_v38 = vpack.i.b16 %v350_v12, %v325_v23  ;;  %v698_v39 = vpack.i.b16 %v639_v18, %v614_v27  ;;  %v699_v40 = vshrl.u32 %v614_v27, 16 }
 0x200   :  { %2373 = vmatprep.subr.bf16.mxu0 %v2637_v0  ;;  %v656_v41 = vcombine.low %v647_v20, %v655_v24  ;;  %v352_v43 = vcombine.low %v224_v28, %v231_v29  ;;  %v2275_v44 = vcombine.high %v224_v28, %v231_v29  ;;  %v688_v49 = vrot.slane %v681_v34, %v2727_v42 }
 0x201   :  { %v407_v47 = vpack.i.b16 %v406_v31, %v405_v37  ;;  %v701_v48 = vpack.i.b16 %v700_v33, %v699_v40  ;;  %v384_v50 = vrot.slane %v377_v35, %v2723_v32  ;;  %v392_v51 = vrot.slane %v2276_v36, %v2723_v32 }
 0x202   :  { %v1091_v52 = vsel %vm994_vm2, %v698_v39, 0  ;;  %v351_v53 = vcombine.high %v350_v12, %v2645_v45  ;;  %v663_v54 = vrot.slane %v656_v41, %v2727_v42  ;;  %v359_v55 = vrot.slane %v352_v43, %v2723_v32 }
 0x203   :  { %v367_v56 = vrot.slane %v2275_v44, %v2723_v32  ;;  %v1137_v57 = vsel %vm994_vm2, %v701_v48, 0  ;;  %v326_v58 = vcombine.high %v325_v23, %v2645_v45  ;;  %v706_v59 = vshrl.u32 %v688_v49, 16 }
 0x204   :  { %2358 = vmatmul.mubr.msk.bf16.vlgmr.msra.gmra.mxu1 %vm994_vm2, %v404_v38  ;;  %v393_v60 = vcombine.low %v384_v50, %v392_v51  ;;  %v704_v61 = vpack.i.b16 %v688_v49, %v663_v54  ;;  %v412_v62 = vshrl.u32 %v351_v53, 16  ;;  %v705_v63 = vshrl.u32 %v663_v54, 16 }
 0x205   :  { %2368 = vmatpush3.bf16.xpose.msra.mxu1 %v1091_v52  ;;  %2369 = vmatprep.mubr.msk.bf16.mxu1 %vm2638_vm0, %v2637_v0  ;;  %v368_v1 = vcombine.low %v359_v55, %v367_v56  ;;  %v410_v2 = vpack.i.b16 %v351_v53, %v326_v58  ;;  %v411_v3 = vshrl.u32 %v326_v58, 16  ;;  %v689_v5 = vcombine.high %v688_v49, %v2645_v45 }
 0x206   :  { %2364 = vmatmul.mubr.msk.bf16.vlgmr.msra.gmra.mxu0 %vm994_vm2, %v407_v47  ;;  %2379 = vmatprep.subr.bf16.mxu1 %v2637_v0  ;;  %v707_v4 = vpack.i.b16 %v706_v59, %v705_v63  ;;  %v1183_v6 = vsel %vm994_vm2, %v704_v61, 0  ;;  %v400_v8 = vrot.slane %v393_v60, %v2727_v42  ;;  %v664_v9 = vcombine.high %v663_v54, %v2645_v45 }
 0x207   :  { %2374 = vmatpush3.bf16.xpose.msra.mxu0 %v1137_v57  ;;  %2375 = vmatprep.mubr.msk.bf16.mxu0 %vm2638_vm0, %v2637_v0  ;;  %v413_v7 = vpack.i.b16 %v412_v62, %v411_v3  ;;  %v375_v11 = vrot.slane %v368_v1, %v2727_v42  ;;  %v712_v12 = vshrl.u32 %v689_v5, 16 }
 0x208   :  { %2385 = vmatprep.subr.bf16.mxu0 %v2637_v0  ;;  %v1229_v10 = vsel %vm994_vm2, %v707_v4, 0  ;;  %v710_v13 = vpack.i.b16 %v689_v5, %v664_v9  ;;  %v418_v14 = vshrl.u32 %v400_v8, 16  ;;  %v711_v15 = vshrl.u32 %v664_v9, 16  ;;  %v715_v9 = vpop.permute.xlu0 %714 }
 0x209   :  { %v416_v18 = vpack.i.b16 %v400_v8, %v375_v11  ;;  %v417_v19 = vshrl.u32 %v375_v11, 16  ;;  %v401_v23 = vcombine.high %v400_v8, %v2645_v45  ;;  %v376_v25 = vcombine.high %v375_v11, %v2645_v45 }
 0x20a   :  { %v713_v20 = vpack.i.b16 %v712_v12, %v711_v15  ;;  %v1275_v21 = vsel %vm994_vm2, %v710_v13, 0 }
 0x20b   :  { %v419_v22 = vpack.i.b16 %v418_v14, %v417_v19  ;;  %v424_v26 = vshrl.u32 %v401_v23, 16  ;;  %v422_v27 = vpack.i.b16 %v401_v23, %v376_v25  ;;  %v423_v28 = vshrl.u32 %v376_v25, 16 }
 0x20c   :  { %2370 = vmatmul.mubr.msk.bf16.vlgmr.msra.gmra.mxu1 %vm994_vm2, %v410_v2  ;;  %v1321_v24 = vsel %vm994_vm2, %v713_v20, 0 }
 0x20d   :  { %2380 = vmatpush3.bf16.xpose.msra.mxu1 %v1183_v6  ;;  %2381 = vmatprep.mubr.msk.bf16.mxu1 %vm2638_vm0, %v2637_v0  ;;  %v425_v29 = vpack.i.b16 %v424_v26, %v423_v28 }
 0x20e   :  { %2376 = vmatmul.mubr.msk.bf16.vlgmr.msra.gmra.mxu0 %vm994_vm2, %v413_v7  ;;  %2391 = vmatprep.subr.bf16.mxu1 %v2637_v0 }
 0x20f   :  { %2386 = vmatpush3.bf16.xpose.msra.mxu0 %v1229_v10  ;;  %2387 = vmatprep.mubr.msk.bf16.mxu0 %vm2638_vm0, %v2637_v0  ;;  %v717_v10 = vpop.permute.xlu1 %716 }
 0x210   :  { %2397 = vmatprep.subr.bf16.mxu0 %v2637_v0  ;;  %v2885_v20 = vpack.i.b16 %v717_v10, %v715_v9 }
 0x212   :  { %v745_v28 = vrot.slane %v2885_v20, %v2723_v32 }
 0x214   :  { %2382 = vmatmul.mubr.msk.bf16.vlgmr.msra.gmra.mxu1 %vm994_vm2, %v416_v18  ;;  %v727_v18 = vshrl.u32 %v717_v10, 16 }
 0x215   :  { %2392 = vmatpush3.bf16.xpose.msra.mxu1 %v1275_v21  ;;  %2393 = vmatprep.mubr.msk.bf16.mxu1 %vm2638_vm0, %v2637_v0 }
 0x216   :  { %2388 = vmatmul.mubr.msk.bf16.vlgmr.msra.gmra.mxu0 %vm994_vm2, %v419_v22  ;;  %2403 = vmatprep.subr.bf16.mxu1 %v2637_v0  ;;  %v726_v22 = vshrl.u32 %v715_v9, 16 }
 0x217   :  { %2398 = vmatpush3.bf16.xpose.msra.mxu0 %v1321_v24  ;;  %2399 = vmatprep.mubr.msk.bf16.mxu0 %vm2638_vm0, %v2637_v0 }
 0x218   :  { %2409 = vmatprep.subr.bf16.mxu0 %v2637_v0 }
 0x21c   :  { %2394 = vmatmul.mubr.msk.bf16.vlgmr.msra.gmra.mxu1 %vm994_vm2, %v422_v27  ;;  %v2889_v27 = vpack.i.b16 %v727_v18, %v726_v22 }
 0x21d   :  { %2405 = vmatprep.mubr.msk.bf16.mxu1 %vm2638_vm0, %v2637_v0 }
 0x21e   :  { %2400 = vmatmul.mubr.msk.bf16.vlgmr.msra.gmra.mxu0 %vm994_vm2, %v425_v29 }
 0x21f   :  { %2411 = vmatprep.mubr.msk.bf16.mxu0 %vm2638_vm0, %v2637_v0 }
 0x2c4   :  { %v1035_v30 = vpop.f32.mrf.mxu1 }
 0x2c5   :  { %v1363_v31 = vsel %vm994_vm2, %v1035_v30, -inf }
 0x2c6   :  { %1364 = vmax.xlane.f32.xlu0 %v1363_v31  ;;  %v2359_v33 = vpop.f32.mrf.mxu1  ;;  %v1081_v34 = vpop.f32.mrf.mxu0 }
 0x2c7   :  { %v1366_v35 = vsel %vm994_vm2, %v1081_v34, -inf }
 0x2c8   :  { %v1038_v36 = vpop.f32.mrf.mxu1  ;;  %1367 = vmax.xlane.f32.xlu1 %v1366_v35  ;;  %v2365_v37 = vpop.f32.mrf.mxu0 }
 0x2ca   :  { %v2360_v38 = vpop.f32.mrf.mxu1  ;;  %v1084_v39 = vpop.f32.mrf.mxu0 }
 0x2cc   :  { %v2366_v40 = vpop.f32.mrf.mxu0  ;;  %v2851_v41 = vpop.f32.mrf.mxu1 }
 0x2cd   :  { %v1369_v5 = vsel %vm994_vm2, %v2851_v41, -inf }
 0x2ce   :  { %v2371_v43 = vpop.f32.mrf.mxu1  ;;  %v2853_v44 = vpop.f32.mrf.mxu0 }
 0x2d0   :  { %v1130_v47 = vpop.f32.mrf.mxu1  ;;  %v2377_v48 = vpop.f32.mrf.mxu0 }
 0x2d2   :  { %v2372_v49 = vpop.f32.mrf.mxu1  ;;  %v1176_v50 = vpop.f32.mrf.mxu0 }
 0x2d4   :  { %v2378_v51 = vpop.f32.mrf.mxu0  ;;  %v2855_v52 = vpop.f32.mrf.mxu1 }
 0x2d6   :  { %v2383_v53 = vpop.f32.mrf.mxu1  ;;  %v2857_v54 = vpop.f32.mrf.mxu0 }
 0x2d7   :  { %v1378_v7 = vsel %vm994_vm2, %v2857_v54, -inf }
 0x2d8   :  { %v1222_v55 = vpop.f32.mrf.mxu1  ;;  %v2389_v56 = vpop.f32.mrf.mxu0 }
 0x2d9   :  { %720 = vrot.lane.b32.xlu1 %v2712_v16, %s2634_s23  ;;  %v1372_v16 = vsel %vm994_vm2, %v2853_v44, -inf }
 0x2da   :  { %v2384_v57 = vpop.f32.mrf.mxu1  ;;  %v1268_v58 = vpop.f32.mrf.mxu0 }
 0x2dc   :  { %718 = vrot.lane.b32.xlu0 %v2714_v17, %s2634_s23  ;;  %v2390_v59 = vpop.f32.mrf.mxu0  ;;  %v2863_v60 = vpop.f32.mrf.mxu1  ;;  %v1375_v17 = vsel %vm994_vm2, %v2855_v52, -inf }
 0x2dd   :  { %v1381_v6 = vsel %vm994_vm2, %v2863_v60, -inf }
 0x2de   :  { %v2395_v61 = vpop.f32.mrf.mxu1  ;;  %v2865_v62 = vpop.f32.mrf.mxu0 }
 0x2df   :  { %v1384_v8 = vsel %vm994_vm2, %v2865_v62, -inf }
 0x2e0   :  { %v1314_v63 = vpop.f32.mrf.mxu1  ;;  %v2401_v1 = vpop.f32.mrf.mxu0 }
 0x2e2   :  { %v2396_v2 = vpop.f32.mrf.mxu1  ;;  %v1360_v3 = vpop.f32.mrf.mxu0 }
 0x2e4   :  { %v2402_v4 = vpop.f32.mrf.mxu0 }
 0x2fb   :  { %1370 = vmax.xlane.f32.xlu0 %v1369_v5 }
 0x2fd   :  { %1373 = vmax.xlane.f32.xlu1 %v1372_v16 }
 0x2ff   :  { %1376 = vmax.xlane.f32.xlu0 %v1375_v17 }
 0x301   :  { %1382 = vmax.xlane.f32.xlu1 %v1381_v6 }
 0x303   :  { %1379 = vmax.xlane.f32.xlu0 %v1378_v7 }
 0x307   :  { %1385 = vmax.xlane.f32.xlu0 %v1384_v8 }
 0x34f   :  { %v2879_v11 = vpop.xlane.xlu0 %1364 }
 0x350   :  { %v1411_v12 = vsub.f32 %v1035_v30, %v2879_v11 }
 0x351   :  { %v2882_v13 = vpop.xlane.xlu1 %1367 }
 0x352   :  { %v1419_v14 = vmul.f32 1.442695, %v1411_v12  ;;  %v1412_v15 = vsub.f32 %v1081_v34, %v2882_v13  ;;  %v811_v34 = vrot.slane %v2889_v27, %v2723_v32 }
 0x353   :  { %v719_v19 = vpop.permute.xlu0 %718 }
 0x354   :  { %v1421_v21 = vmul.f32 1.442695, %v1412_v15  ;;  %2498 = vpow2.f32 %v1419_v14  ;;  %v734_v24 = vshrl.u32 %v719_v19, 16 }
 0x355   :  { %v721_v23 = vpop.permute.xlu1 %720 }
 0x356   :  { %v2887_v25 = vpack.i.b16 %v721_v23, %v719_v19  ;;  %v735_v26 = vshrl.u32 %v721_v23, 16  ;;  %2500 = vpow2.f32 %v1421_v21 }
 0x358   :  { %v2893_v29 = vpack.i.b16 %v735_v26, %v734_v24  ;;  %v760_v30 = vrot.slane %v2887_v25, %v2723_v32  ;;  %v804_v24 = vcombine.high %v2889_v27, %v2731_v46  ;;  %v753_v26 = vcombine.high %v2887_v25, %v2731_v46 }
 0x35a   :  { %v768_v31 = vcombine.low %v745_v28, %v760_v30  ;;  %v769_v33 = vcombine.high %v745_v28, %v760_v30  ;;  %v826_v35 = vrot.slane %v2893_v29, %v2723_v32  ;;  %v819_v23 = vcombine.high %v2893_v29, %v2731_v46 }
 0x35b   :  { %v738_v28 = vcombine.high %v2885_v20, %v2731_v46 }
 0x35c   :  { %v776_v36 = vrot.slane %v768_v31, %v2727_v42  ;;  %v783_v37 = vrot.slane %v769_v33, %v2727_v42  ;;  %v834_v38 = vcombine.low %v811_v34, %v826_v35  ;;  %v835_v39 = vcombine.high %v811_v34, %v826_v35 }
 0x35d   :  { %v833_v30 = vrot.slane %v819_v23, %v2723_v32  ;;  %v818_v31 = vrot.slane %v804_v24, %v2723_v32  ;;  %v767_v33 = vrot.slane %v753_v26, %v2723_v32  ;;  %v752_v34 = vrot.slane %v738_v28, %v2723_v32 }
 0x35e   :  { %v870_v40 = vcombine.low %v776_v36, %v783_v37  ;;  %v2281_v43 = vcombine.high %v776_v36, %v783_v37  ;;  %v842_v47 = vrot.slane %v834_v38, %v2727_v42  ;;  %v849_v48 = vrot.slane %v835_v39, %v2727_v42 }
 0x35f   :  { %v850_v35 = vcombine.low %v818_v31, %v833_v30  ;;  %v851_v36 = vcombine.high %v818_v31, %v833_v30  ;;  %v784_v29 = vcombine.low %v752_v34, %v767_v33  ;;  %v785_v37 = vcombine.high %v752_v34, %v767_v33 }
 0x360   :  { %v877_v49 = vrot.slane %v870_v40, %v2723_v32  ;;  %v885_v50 = vrot.slane %v2281_v43, %v2723_v32  ;;  %v895_v51 = vcombine.low %v842_v47, %v849_v48  ;;  %v2282_v53 = vcombine.high %v842_v47, %v849_v48 }
 0x361   :  { %v2499_v55 = vpop.eup %2498  ;;  %v858_v27 = vrot.slane %v850_v35, %v2727_v42  ;;  %v865_v38 = vrot.slane %v851_v36, %v2727_v42  ;;  %v792_v25 = vrot.slane %v784_v29, %v2727_v42  ;;  %v799_v46 = vrot.slane %v785_v37, %v2727_v42 }
 0x362   :  { %v886_v56 = vcombine.low %v877_v49, %v885_v50  ;;  %v902_v57 = vrot.slane %v895_v51, %v2723_v32  ;;  %v910_v58 = vrot.slane %v2282_v53, %v2723_v32  ;;  %v1443_v61 = vsel %vm994_vm2, %v2499_v55, 0.0 }
 0x363   :  { %v2501_v59 = vpop.eup %2500  ;;  %1444 = vadd.xlane.f32.xlu1 %v1443_v61  ;;  %v1475_v15 = vpack.c.bf16 %v2499_v55, %v2499_v55  ;;  %v945_v20 = vcombine.low %v858_v27, %v865_v38  ;;  %v2284_v39 = vcombine.high %v858_v27, %v865_v38  ;;  %v920_v47 = vcombine.low %v792_v25, %v799_v46 }
 0x364   :  { %v893_v63 = vrot.slane %v886_v56, %v2727_v42  ;;  %v1446_v1 = vsel %vm994_vm2, %v2501_v59, 0.0  ;;  %v911_v2 = vcombine.low %v902_v57, %v910_v58  ;;  %v1476_v21 = vpack.c.bf16 %v2501_v59, %v2501_v59 }
 0x365   :  { %1447 = vadd.xlane.f32.xlu0 %v1446_v1  ;;  %v2283_v48 = vcombine.high %v792_v25, %v799_v46  ;;  %v952_v55 = vrot.slane %v945_v20, %v2723_v32  ;;  %v960_v56 = vrot.slane %v2284_v39, %v2723_v32  ;;  %v927_v58 = vrot.slane %v920_v47, %v2723_v32 }
 0x366   :  { %v894_v3 = vcombine.high %v893_v63, %v2645_v45  ;;  %v918_v4 = vrot.slane %v911_v2, %v2727_v42  ;;  %v973_v16 = vshrl.u32 %v893_v63, 16 }
 0x367   :  { %v935_v59 = vrot.slane %v2283_v48, %v2723_v32  ;;  %v961_v2 = vcombine.low %v952_v55, %v960_v56  ;;  %v1387_v48 = vsub.f32 -inf, %v2879_v11  ;;  %v1388_v56 = vsub.f32 -inf, %v2882_v13 }
 0x368   :  { %v972_v5 = vpack.i.b16 %v918_v4, %v893_v63  ;;  %v974_v17 = vshrl.u32 %v918_v4, 16  ;;  %v919_v6 = vcombine.high %v918_v4, %v2645_v45  ;;  %v979_v7 = vshrl.u32 %v894_v3, 16 }
 0x36a   :  { %v1488_v8 = vsel %vm1486_vm3, %v972_v5, 0  ;;  %v975_v9 = vpack.i.b16 %v974_v17, %v973_v16  ;;  %v978_v10 = vpack.i.b16 %v919_v6, %v894_v3  ;;  %v980_v12 = vshrl.u32 %v919_v6, 16 }
 0x36b   :  { %2404 = vmatpush3.bf16.msra.mxu1 %v1488_v8  ;;  %v936_v5 = vcombine.low %v927_v58, %v935_v59 }
 0x36c   :  { %v1534_v14 = vsel %vm1486_vm3, %v975_v9, 0  ;;  %2415 = vmatprep.subr.bf16.mxu1 %v2637_v0  ;;  %v981_v18 = vpack.i.b16 %v980_v12, %v979_v7  ;;  %v1580_v19 = vsel %vm1486_vm3, %v978_v10, 0 }
 0x36d   :  { %2410 = vmatpush3.bf16.msra.mxu0 %v1534_v14  ;;  %v943_v6 = vrot.slane %v936_v5, %v2727_v42 }
 0x36e   :  { %2406 = vmatmul.mubr.msk.bf16.vlgmr.msra.gmra.mxu1 %vm994_vm2, %v1475_v15  ;;  %2421 = vmatprep.subr.bf16.mxu0 %v2637_v0  ;;  %v1626_v22 = vsel %vm1486_vm3, %v981_v18, 0 }
 0x36f   :  { %2416 = vmatpush3.bf16.msra.mxu1 %v1580_v19  ;;  %2417 = vmatprep.mubr.msk.bf16.mxu1 %vm2638_vm0, %v2637_v0  ;;  %v985_v10 = vshrl.u32 %v943_v6, 16  ;;  %v944_v23 = vcombine.high %v943_v6, %v2645_v45 }
 0x370   :  { %2412 = vmatmul.mubr.msk.bf16.vlgmr.msra.gmra.mxu0 %vm994_vm2, %v1476_v21  ;;  %2427 = vmatprep.subr.bf16.mxu1 %v2637_v0 }
 0x371   :  { %2422 = vmatpush3.bf16.msra.mxu0 %v1626_v22  ;;  %2423 = vmatprep.mubr.msk.bf16.mxu0 %vm2638_vm0, %v2637_v0 }
 0x372   :  { %2433 = vmatprep.subr.bf16.mxu0 %v2637_v0 }
 0x384   :  { %v2945_v40 = vpop.xlane.xlu0 %1370 }
 0x385   :  { %v1413_v43 = vsub.f32 %v2851_v41, %v2945_v40 }
 0x386   :  { %v2949_v49 = vpop.xlane.xlu1 %1373 }
 0x387   :  { %v1423_v50 = vmul.f32 1.442695, %v1413_v43  ;;  %v1414_v51 = vsub.f32 %v2853_v44, %v2949_v49 }
 0x388   :  { %v2953_v53 = vpop.xlane.xlu0 %1376 }
 0x389   :  { %v1425_v57 = vmul.f32 1.442695, %v1414_v51  ;;  %2502 = vpow2.f32 %v1423_v50  ;;  %v1415_v41 = vsub.f32 %v2855_v52, %v2953_v53  ;;  %v968_v52 = vrot.slane %v961_v2, %v2727_v42 }
 0x38a   :  { %v2961_v61 = vpop.xlane.xlu1 %1382  ;;  %v1389_v50 = vsub.f32 -inf, %v2945_v40  ;;  %v1391_v11 = vsub.f32 -inf, %v2953_v53 }
 0x38b   :  { %v1417_v44 = vsub.f32 %v2863_v60, %v2961_v61  ;;  %2504 = vpow2.f32 %v1425_v57  ;;  %v1427_v63 = vmul.f32 1.442695, %v1415_v41  ;;  %v986_v8 = vshrl.u32 %v968_v52, 16 }
 0x38c   :  { %v2965_v1 = vpop.xlane.xlu0 %1379  ;;  %v984_v9 = vpack.i.b16 %v968_v52, %v943_v6  ;;  %v969_v18 = vcombine.high %v968_v52, %v2645_v45  ;;  %v991_v45 = vshrl.u32 %v944_v23, 16  ;;  %v1390_v57 = vsub.f32 -inf, %v2949_v49 }
 0x38d   :  { %v1431_v3 = vmul.f32 1.442695, %v1417_v44  ;;  %2506 = vpow2.f32 %v1427_v63  ;;  %v1416_v4 = vsub.f32 %v2857_v54, %v2965_v1  ;;  %v987_v15 = vpack.i.b16 %v986_v8, %v985_v10 }
 0x38e   :  { %v992_v30 = vshrl.u32 %v969_v18, 16  ;;  %v990_v33 = vpack.i.b16 %v969_v18, %v944_v23  ;;  %v1395_v41 = vmul.f32 1.442695, %v1387_v48  ;;  %v1399_v44 = vmul.f32 1.442695, %v1389_v50 }
 0x38f   :  { %2508 = vpow2.f32 %v1431_v3  ;;  %v1429_v16 = vmul.f32 1.442695, %v1416_v4  ;;  %v1718_v26 = vsel %vm1486_vm3, %v987_v15, 0  ;;  %v1397_v3 = vmul.f32 1.442695, %v1388_v56 }
 0x390   :  { %v2969_v17 = vpop.xlane.xlu0 %1385  ;;  %v993_v37 = vpack.i.b16 %v992_v30, %v991_v45  ;;  %v1764_v27 = vsel %vm1486_vm3, %v990_v33, 0  ;;  %v1401_v4 = vmul.f32 1.442695, %v1390_v57  ;;  %v1393_v40 = vsub.f32 -inf, %v2961_v61 }
 0x391   :  { %v1418_v60 = vsub.f32 %v2865_v62, %v2969_v17  ;;  %2510 = vpow2.f32 %v1429_v16  ;;  %v1672_v62 = vsel %vm1486_vm3, %v984_v9, 0  ;;  %v1403_v13 = vmul.f32 1.442695, %v1391_v11 }
 0x392   :  { %v1810_v46 = vsel %vm1486_vm3, %v993_v37, 0  ;;  %v1392_v49 = vsub.f32 -inf, %v2965_v1  ;;  %v1394_v16 = vsub.f32 -inf, %v2969_v17  ;;  %v1407_v52 = vmul.f32 1.442695, %v1393_v40 }
 0x393   :  { %v1433_v7 = vmul.f32 1.442695, %v1418_v60 }
 0x394   :  { %v1405_v8 = vmul.f32 1.442695, %v1392_v49 }
 0x395   :  { %2512 = vpow2.f32 %v1433_v7 }
 0x396   :  { %v2503_v12 = vpop.eup %2502  ;;  %2514 = vpow2.f32 %v1395_v41 }
 0x397   :  { %v1449_v54 = vsel %vm994_vm2, %v2503_v12, 0.0  ;;  %v1477_v14 = vpack.c.bf16 %v2503_v12, %v2503_v12  ;;  %2516 = vpow2.f32 %v1399_v44  ;;  %v1409_v12 = vmul.f32 1.442695, %v1394_v16 }
 0x398   :  { %v2505_v19 = vpop.eup %2504  ;;  %1450 = vadd.xlane.f32.xlu1 %v1449_v54  ;;  %2518 = vpow2.f32 %v1397_v3 }
 0x399   :  { %2418 = vmatmul.mubr.msk.bf16.vlgmr.msra.gmra.mxu1 %vm994_vm2, %v1477_v14  ;;  %v1452_v21 = vsel %vm994_vm2, %v2505_v19, 0.0  ;;  %v1478_v22 = vpack.c.bf16 %v2505_v19, %v2505_v19  ;;  %2520 = vpow2.f32 %v1401_v4 }
 0x39a   :  { %v2507_v24 = vpop.eup %2506  ;;  %2428 = vmatpush3.bf16.msra.mxu1 %v1672_v62  ;;  %1453 = vadd.xlane.f32.xlu0 %v1452_v21  ;;  %2522 = vpow2.f32 %v1403_v13 }
 0x39b   :  { %2424 = vmatmul.mubr.msk.bf16.vlgmr.msra.gmra.mxu0 %vm994_vm2, %v1478_v22  ;;  %v1455_v28 = vsel %vm994_vm2, %v2507_v24, 0.0  ;;  %2429 = vmatprep.mubr.msk.bf16.mxu1 %vm2638_vm0, %v2637_v0  ;;  %v1479_v29 = vpack.c.bf16 %v2507_v24, %v2507_v24  ;;  %2524 = vpow2.f32 %v1407_v52 }
 0x39c   :  { %v2509_v31 = vpop.eup %2508  ;;  %2434 = vmatpush3.bf16.msra.mxu0 %v1718_v26  ;;  %1456 = vadd.xlane.f32.xlu1 %v1455_v28  ;;  %2526 = vpow2.f32 %v1405_v8 }
 0x39d   :  { %2439 = vmatprep.subr.bf16.mxu1 %v2637_v0  ;;  %2435 = vmatprep.mubr.msk.bf16.mxu0 %vm2638_vm0, %v2637_v0  ;;  %v1461_v35 = vsel %vm994_vm2, %v2509_v31, 0.0  ;;  %v1481_v39 = vpack.c.bf16 %v2509_v31, %v2509_v31  ;;  %2528 = vpow2.f32 %v1409_v12 }
 0x39e   :  { %v2511_v34 = vpop.eup %2510  ;;  %2445 = vmatprep.subr.bf16.mxu0 %v2637_v0 }
 0x39f   :  { %v1458_v36 = vsel %vm994_vm2, %v2511_v34, 0.0  ;;  %v1480_v38 = vpack.c.bf16 %v2511_v34, %v2511_v34 }
 0x3a0   :  { %1462 = vadd.xlane.f32.xlu1 %v1461_v35  ;;  %1459 = vadd.xlane.f32.xlu0 %v1458_v36 }
 0x3a1   :  { %2430 = vmatmul.mubr.msk.bf16.vlgmr.msra.gmra.mxu1 %vm994_vm2, %v1479_v29 }
 0x3a2   :  { %v2513_v25 = vpop.eup %2512  ;;  %2440 = vmatpush3.bf16.msra.mxu1 %v1764_v27  ;;  %2441 = vmatprep.mubr.msk.bf16.mxu1 %vm2638_vm0, %v2637_v0 }
 0x3a3   :  { %2436 = vmatmul.mubr.msk.bf16.vlgmr.msra.gmra.mxu0 %vm994_vm2, %v1480_v38  ;;  %v1464_v20 = vsel %vm994_vm2, %v2513_v25, 0.0  ;;  %2451 = vmatprep.subr.bf16.mxu1 %v2637_v0  ;;  %v1482_v43 = vpack.c.bf16 %v2513_v25, %v2513_v25  ;;  %v2515_v6 = vpop.eup %2514 }
 0x3a4   :  { %2446 = vmatpush3.bf16.msra.mxu0 %v1810_v46  ;;  %1465 = vadd.xlane.f32.xlu0 %v1464_v20  ;;  %v2517_v7 = vpop.eup %2516  ;;  %v1435_v14 = vmul.f32 0.0, %v2515_v6 }
 0x3a5   :  { %2447 = vmatprep.mubr.msk.bf16.mxu0 %vm2638_vm0, %v2637_v0  ;;  %v2519_v10 = vpop.eup %2518  ;;  %v1437_v15 = vmul.f32 0.0, %v2517_v7 }
 0x3a6   :  { %v2521_v54 = vpop.eup %2520  ;;  %v1436_v18 = vmul.f32 0.0, %v2519_v10 }
 0x3a7   :  { %v1438_v19 = vmul.f32 0.0, %v2521_v54  ;;  %v2523_v23 = vpop.eup %2522 }
 0x3a8   :  { %v2525_v26 = vpop.eup %2524  ;;  %v1439_v28 = vmul.f32 0.0, %v2523_v23 }
 0x3a9   :  { %2442 = vmatmul.mubr.msk.bf16.vlgmr.msra.gmra.mxu1 %vm994_vm2, %v1481_v39  ;;  %v2527_v30 = vpop.eup %2526  ;;  %v3016_v34 = vmul.f32 0.0, %v2525_v26 }
 0x3aa   :  { %2455 = vmatprep.mubr.msk.bf16.mxu1 %vm2638_vm0, %v2637_v0  ;;  %v2529_v33 = vpop.eup %2528  ;;  %v1440_v29 = vmul.f32 0.0, %v2527_v30 }
 0x3ab   :  { %2448 = vmatmul.mubr.msk.bf16.vlgmr.msra.gmra.mxu0 %vm994_vm2, %v1482_v43  ;;  %v3019_v25 = vmul.f32 0.0, %v2529_v33 }
 0x3ec   :  { %v1445_v60 = vpop.xlane.xlu1 %1444 }
 0x3ed   :  { %v1467_v61 = vadd.f32 %v1445_v60, %v1435_v14 }
 0x3ee   :  { %v1448_v9 = vpop.xlane.xlu0 %1447 }
 0x3ef   :  { %v1468_v62 = vadd.f32 %v1448_v9, %v1436_v18  ;;  %2530 = vrcp.f32 %v1467_v61 }
 0x3fc   :  { %v2531_v38 = vpop.eup %2530 }
 0x421   :  { %v1451_v53 = vpop.xlane.xlu1 %1450 }
 0x422   :  { %v1469_v17 = vadd.f32 %v1451_v53, %v1437_v15 }
 0x423   :  { %v1454_v1 = vpop.xlane.xlu0 %1453 }
 0x424   :  { %v1470_v21 = vadd.f32 %v1454_v1, %v1438_v19  ;;  %2532 = vrcp.f32 %v1469_v17 }
 0x425   :  { %2534 = vrcp.f32 %v1468_v62  ;;  %v1457_v22 = vpop.xlane.xlu1 %1456 }
 0x426   :  { %2536 = vrcp.f32 %v1470_v21  ;;  %v1471_v45 = vadd.f32 %v1457_v22, %v1439_v28 }
 0x428   :  { %2538 = vrcp.f32 %v1471_v45 }
 0x429   :  { %v1460_v24 = vpop.xlane.xlu0 %1459  ;;  %v1463_v31 = vpop.xlane.xlu1 %1462 }
 0x42a   :  { %v1473_v36 = vadd.f32 %v1463_v31, %v3016_v34  ;;  %v1472_v43 = vadd.f32 %v1460_v24, %v1440_v29 }
 0x42c   :  { %2540 = vrcp.f32 %v1473_v36 }
 0x42d   :  { %v1466_v37 = vpop.xlane.xlu0 %1465  ;;  %2542 = vrcp.f32 %v1472_v43 }
 0x42e   :  { %v1524_v47 = vpop.f32.mrf.mxu1  ;;  %v1474_v56 = vadd.f32 %v1466_v37, %v3019_v25 }
 0x42f   :  { %v1852_v35 = vadd.f32 %v1524_v47, %v1435_v14 }
 0x430   :  { %v2407_v51 = vpop.f32.mrf.mxu1  ;;  %v3008_v55 = vpop.f32.mrf.mxu0  ;;  %2544 = vrcp.f32 %v1474_v56 }
 0x431   :  { %v1853_v46 = vadd.f32 %v3008_v55, %v1436_v18  ;;  %v2533_v39 = vpop.eup %2532  ;;  %v1868_v47 = vmul.f32 %v2531_v38, %v1852_v35 }
 0x432   :  { %v1527_v58 = vpop.f32.mrf.mxu1  ;;  %v2413_v59 = vpop.f32.mrf.mxu0 }
 0x433   :  { %v2535_v51 = vpop.eup %2534 }
 0x434   :  { %v2408_v63 = vpop.f32.mrf.mxu1  ;;  %v1573_v2 = vpop.f32.mrf.mxu0 }
 0x435   :  { %v2537_v59 = vpop.eup %2536  ;;  %v1869_v63 = vmul.f32 %v2535_v51, %v1853_v46 }
 0x436   :  { %v2414_v5 = vpop.f32.mrf.mxu0  ;;  %v2539_v21 = vpop.eup %2538 }
 0x439   :  { %v2541_v45 = vpop.eup %2540 }
 0x459   :  { %v1616_v27 = vpop.f32.mrf.mxu1 }
 0x45a   :  { %v1854_v20 = vadd.f32 %v1616_v27, %v1437_v15 }
 0x45b   :  { %v2419_v48 = vpop.f32.mrf.mxu1  ;;  %v1662_v50 = vpop.f32.mrf.mxu0 }
 0x45c   :  { %v1870_v57 = vmul.f32 %v2533_v39, %v1854_v20  ;;  %v1855_v58 = vadd.f32 %v1662_v50, %v1438_v19  ;;  %v2543_v39 = vpop.eup %2542 }
 0x45d   :  { %v1619_v41 = vpop.f32.mrf.mxu1  ;;  %v2425_v44 = vpop.f32.mrf.mxu0 }
 0x45e   :  { %v1876_v2 = vcombine.low %v1868_v47, %v1870_v57  ;;  %v1877_v3 = vcombine.high %v1868_v47, %v1870_v57  ;;  %v1871_v55 = vmul.f32 %v2537_v59, %v1855_v58  ;;  %v2545_v51 = vpop.eup %2544 }
 0x45f   :  { %v2420_v4 = vpop.f32.mrf.mxu1  ;;  %v1665_v5 = vpop.f32.mrf.mxu0 }
 0x460   :  { %v1892_v11 = vcombine.low %v1869_v63, %v1871_v55  ;;  %v1893_v40 = vcombine.high %v1869_v63, %v1871_v55  ;;  %v1884_v16 = vrot.slane %v1876_v2, %v2723_v32  ;;  %v1891_v52 = vrot.slane %v1877_v3, %v2723_v32 }
 0x461   :  { %v2426_v13 = vpop.f32.mrf.mxu0  ;;  %v1708_v49 = vpop.f32.mrf.mxu1 }
 0x462   :  { %v1900_v60 = vrot.slane %v1892_v11, %v2723_v32  ;;  %v1907_v6 = vrot.slane %v1893_v40, %v2723_v32  ;;  %v1856_v17 = vadd.f32 %v1708_v49, %v1439_v28 }
 0x463   :  { %v2431_v7 = vpop.f32.mrf.mxu1  ;;  %v1754_v8 = vpop.f32.mrf.mxu0 }
 0x464   :  { %v1908_v9 = vcombine.low %v1884_v16, %v1900_v60  ;;  %v1909_v10 = vcombine.high %v1884_v16, %v1900_v60  ;;  %v1924_v12 = vcombine.low %v1891_v52, %v1907_v6  ;;  %v1925_v54 = vcombine.high %v1891_v52, %v1907_v6 }
 0x465   :  { %v1711_v14 = vpop.f32.mrf.mxu1  ;;  %v2437_v53 = vpop.f32.mrf.mxu0  ;;  %v1857_v30 = vadd.f32 %v1754_v8, %v1440_v29  ;;  %v1872_v28 = vmul.f32 %v2539_v21, %v1856_v17 }
 0x466   :  { %v1916_v15 = vrot.slane %v1908_v9, %v2727_v42  ;;  %v1923_v61 = vrot.slane %v1909_v10, %v2727_v42  ;;  %v1932_v18 = vrot.slane %v1924_v12, %v2727_v42  ;;  %v1939_v1 = vrot.slane %v1925_v54, %v2727_v42 }
 0x467   :  { %v2432_v19 = vpop.f32.mrf.mxu1  ;;  %v1757_v62 = vpop.f32.mrf.mxu0  ;;  %v1873_v56 = vmul.f32 %v2543_v39, %v1857_v30 }
 0x468   :  { %v2012_v22 = vcombine.low %v1916_v15, %v1923_v61  ;;  %v2301_v23 = vcombine.high %v1916_v15, %v1923_v61  ;;  %v2028_v24 = vcombine.low %v1932_v18, %v1939_v1  ;;  %v2302_v26 = vcombine.high %v1932_v18, %v1939_v1  ;;  %v2496_v62 = vld [vmem:[#allocation7 + $0x8] sm:$0xff]  }
 0x469   :  { %v2438_v31 = vpop.f32.mrf.mxu0  ;;  %v1800_v33 = vpop.f32.mrf.mxu1  ;;  %2452 = vmatpush3.bf16.msra.mxu1 %v2496_v62 }
 0x46a   :  { %v1858_v35 = vadd.f32 %v1800_v33, %v3016_v34  ;;  %v2019_v36 = vrot.slane %v2012_v22, %v2723_v32  ;;  %v2027_v37 = vrot.slane %v2301_v23, %v2723_v32  ;;  %v2035_v27 = vrot.slane %v2028_v24, %v2723_v32  ;;  %2453 = vmatprep.subr.bf16.mxu1 %v2637_v0 }
 0x46b   :  { %v2443_v38 = vpop.f32.mrf.mxu1  ;;  %v1846_v46 = vpop.f32.mrf.mxu0  ;;  %v2043_v20 = vrot.slane %v2302_v26, %v2723_v32 }
 0x46c   :  { %v1874_v43 = vmul.f32 %v2541_v45, %v1858_v35  ;;  %v1859_v29 = vadd.f32 %v1846_v46, %v3019_v25  ;;  %v2045_v48 = vcombine.high %v2019_v36, %v2027_v37  ;;  %v2044_v50 = vcombine.low %v2019_v36, %v2027_v37 }
 0x46d   :  { %v1803_v34 = vpop.f32.mrf.mxu1  ;;  %v2449_v47 = vpop.f32.mrf.mxu0  ;;  %v2061_v57 = vcombine.high %v2035_v27, %v2043_v20  ;;  %v2060_v58 = vcombine.low %v2035_v27, %v2043_v20  ;;  %v2497_v27 = vld [vmem:[#allocation7] sm:$0xff]  }
 0x46e   :  { %v1944_v59 = vcombine.low %v1872_v28, %v1874_v43  ;;  %v1945_v41 = vcombine.high %v1872_v28, %v1874_v43  ;;  %v1875_v44 = vmul.f32 %v2545_v51, %v1859_v29  ;;  %v2059_v63 = vrot.slane %v2045_v48, %v2727_v42  ;;  %2454 = vmatpush3.bf16.msra.mxu1 %v2497_v27 }
 0x46f   :  { %v2444_v2 = vpop.f32.mrf.mxu1  ;;  %v1849_v3 = vpop.f32.mrf.mxu0  ;;  %v2075_v55 = vrot.slane %v2061_v57, %v2727_v42  ;;  %v3040_v4 = vrot.slane %v2044_v50, %v2727_v42  ;;  %v2068_v25 = vrot.slane %v2060_v58, %v2727_v42 }
 0x470   :  { %v1960_v5 = vcombine.low %v1873_v56, %v1875_v44  ;;  %v1961_v11 = vcombine.high %v1873_v56, %v1875_v44  ;;  %v1952_v60 = vrot.slane %v1944_v59, %v2723_v32  ;;  %v1959_v6 = vrot.slane %v1945_v41, %v2723_v32  ;;  %v2305_v3 = vld [vmem:[%s3079_s4] ss:$0 sm:$0xff] }
 0x471   :  { %v2450_v40 = vpop.f32.mrf.mxu0  ;;  %v2078_v13 = vcombine.low %v2059_v63, %v2075_v55  ;;  %v2076_v49 = vcombine.low %v3040_v4, %v2068_v25  ;;  %v2077_v16 = vcombine.high %v3040_v4, %v2068_v25  ;;  %v2079_v52 = vcombine.high %v2059_v63, %v2075_v55 }
 0x472   :  { %v1968_v7 = vrot.slane %v1960_v5, %v2723_v32  ;;  %v1975_v8 = vrot.slane %v1961_v11, %v2723_v32 }
 0x474   :  { %v1976_v9 = vcombine.low %v1952_v60, %v1968_v7  ;;  %v1977_v10 = vcombine.high %v1952_v60, %v1968_v7  ;;  %v1992_v12 = vcombine.low %v1959_v6, %v1975_v8  ;;  %v1993_v54 = vcombine.high %v1959_v6, %v1975_v8 }
 0x476   :  { %v1984_v14 = vrot.slane %v1976_v9, %v2727_v42  ;;  %v1991_v53 = vrot.slane %v1977_v10, %v2727_v42  ;;  %v2000_v15 = vrot.slane %v1992_v12, %v2727_v42  ;;  %v2007_v61 = vrot.slane %v1993_v54, %v2727_v42 }
 0x478   :  { %v2080_v18 = vcombine.low %v1984_v14, %v1991_v53  ;;  %v2303_v1 = vcombine.high %v1984_v14, %v1991_v53  ;;  %v2096_v17 = vcombine.low %v2000_v15, %v2007_v61  ;;  %v2304_v19 = vcombine.high %v2000_v15, %v2007_v61 }
 0x47a   :  { %v2087_v21 = vrot.slane %v2080_v18, %v2723_v32  ;;  %v2095_v22 = vrot.slane %v2303_v1, %v2723_v32  ;;  %v2103_v23 = vrot.slane %v2096_v17, %v2723_v32  ;;  %v2111_v24 = vrot.slane %v2304_v19, %v2723_v32 }
 0x47c   :  { %v2113_v26 = vcombine.high %v2087_v21, %v2095_v22  ;;  %v2129_v30 = vcombine.high %v2103_v23, %v2111_v24  ;;  %v2112_v31 = vcombine.low %v2087_v21, %v2095_v22  ;;  %v2128_v33 = vcombine.low %v2103_v23, %v2111_v24 }
 0x47e   :  { %v2127_v45 = vrot.slane %v2113_v26, %v2727_v42  ;;  %v2143_v35 = vrot.slane %v2129_v30, %v2727_v42  ;;  %v2120_v36 = vrot.slane %v2112_v31, %v2727_v42  ;;  %v2136_v37 = vrot.slane %v2128_v33, %v2727_v42 }
 0x480   :  { %v2146_v28 = vcombine.low %v2127_v45, %v2143_v35  ;;  %v2145_v38 = vcombine.high %v2120_v36, %v2136_v37  ;;  %v2144_v46 = vcombine.low %v2120_v36, %v2136_v37  ;;  %v2147_v32 = vcombine.high %v2127_v45, %v2143_v35 }
 0x482   :  { %v2483_v20 = vpack.i.bf16 %v2146_v28, %v2078_v13  ;;  %v2478_v39 = vpack.i.bf16 %v2145_v38, %v2077_v16  ;;  %v2488_v43 = vpack.i.bf16 %v2147_v32, %v2079_v52 }
 0x484   :  { %2484 = vrot.lane.b32.xlu0 %v2483_v20, %s2646_s2  ;;  %2479 = vrot.lane.b32.xlu1 %v2478_v39, %s2647_s13 }
 0x488   :  { %2489 = vrot.lane.b32.xlu1 %v2488_v43, %s2648_s14 }
 0x4f6   :  { %v2485_v0 = vpop.permute.xlu0 %2484  ;;  %v2480_v29 = vpop.permute.xlu1 %2479 }
 0x4f7   :  { %v2482_v48 = vunpack.i.h.bf16 %v2480_v29  ;;  %v2481_v42 = vunpack.i.l.bf16 %v2480_v29  ;;  %v2487_v50 = vunpack.i.h.bf16 %v2485_v0  ;;  %v2486_v51 = vunpack.i.l.bf16 %v2485_v0 }
 0x4f9   :  { %v2172_v56 = vsel %vm994_vm2, %v2076_v49, %v2481_v42  ;;  %v2173_v34 = vsel %vm994_vm2, %v2144_v46, %v2482_v48 }
 0x4fa   :  { %v2490_v47 = vpop.permute.xlu1 %2489  ;;  %v2175_v59 = vsel %vm2174_vm4, %v2172_v56, %v2486_v51  ;;  %v2176_v41 = vsel %vm2174_vm4, %v2173_v34, %v2487_v50 }
 0x4fb   :  { %v2492_v57 = vunpack.i.h.bf16 %v2490_v47  ;;  %v2491_v58 = vunpack.i.l.bf16 %v2490_v47 }
 0x4fd   :  { %v2178_v44 = vsel %vm2177_vm5, %v2175_v59, %v2491_v58  ;;  %v2179_v63 = vsel %vm2177_vm5, %v2176_v41, %v2492_v57 }
 0x4fe   :  { %v2180_v2 = vpack.c.bf16 %v2179_v63, %v2178_v44 }
 0x500   :  { %2456 = vmatmul.mubr.msk.bf16.vlgmr.msra.gmra.mxu1 %vm93_vm1, %v2180_v2 }
 0x5c0   :  { %v2241_v55 = vpop.f32.mrf.mxu1 }
 0x5c1   :  { %v2242_v4 = vadd.f32 %v2305_v3, %v2241_v55 }
 0x5c2   :  { %v2457_v25 = vpop.f32.mrf.mxu1 }
 0x5c3   :  { %2248 = vst.msk [vmem:[#allocation8] sm:$0xff] %vm93_vm1, %v2242_v4 }
 0x5c4   :  { %v2244_v5 = vpop.f32.mrf.mxu1 }
 0x5c5   :  { %v2245_v11 = vadd.f32 %v2305_v3, %v2244_v5 }
 0x5c6   :  { %v2458_v40 = vpop.f32.mrf.mxu1 }
 0x5c7   :  { %2249 = vst.msk [vmem:[#allocation8 + $0x8] sm:$0xff] %vm93_vm1, %v2245_v11 }
 0x5c8   :  { %2617 = shalt.err (!%p2614_p5)
}
 0x5c9   :  { %s2650_s4 = smov 128  }
 0x5ca   :  { %2261 = dma.vmem_to_hbm [thread:$0]  %s2256_s18, 256, %s3080_s5, [#allocation4], %s2650_s4, %s2650_s4, %s2647_s13  }
 0x5cb   :  { %2630 = dma.done.wait [#allocation4], 256  }
 0x5cc   :  { %2631 = vsyncadd [#allocation4], 4294967040 }
 0x5cd   :  { %2265 = vsyncpa [#allocation3], 1 }
 0x5ce   :  { %2266 = vsyncpa [#allocation6], 1 }
 0x5cf   :  { %2267 = vsyncpa [#allocation4], 1 }

</bundles_post_ra>
